<compile_context>
chip_gen: v7x
topology: tpu7x:2x2x1
jax: 0.10.0
libtpu: 0.0.40
codegen_flags: <defaults>
</compile_context>

<pallas_src>
import functools

import jax
import jax.numpy as jnp
from jax.experimental import pallas as pl
from jax.experimental.pallas import tpu as pltpu


def _round_up(x, m):
    return (x + m - 1) // m * m


def _proj_kernel(a_ref, w_ref, bias_ref, o_ref):
    # a_ref:    (tm, K)  compute dtype (bf16 by default)
    # w_ref:    (K, N)   compute dtype, resident across the whole grid
    # bias_ref: (1, N)   f32, resident
    # o_ref:    (tm, N)  f32
    acc = jnp.dot(a_ref[...], w_ref[...], preferred_element_type=jnp.float32)
    o_ref[...] = (acc + bias_ref[...]).astype(o_ref.dtype)


def _pallas_proj(patches, w_flat, bias, *, tm=1024):
    """patches: (M, K), w_flat: (K, N), bias: (N,) -> (M, N) f32.

    1-D grid over M only; weight + bias live in VMEM for the whole call.
    No operand padding: K and N blocks are full-array extents, the partial
    last M block is handled by Pallas masking.
    """
    M, K = patches.shape
    K2, N = w_flat.shape
    assert K == K2

    # Keep tm a multiple of 8 but never (much) larger than the problem.
    tm = min(tm, _round_up(M, 8))
    grid = (pl.cdiv(M, tm),)

    bias2d = bias.reshape(1, N).astype(jnp.float32)

    bytes_accessed = (
        M * K * patches.dtype.itemsize
        + K * N * w_flat.dtype.itemsize
        + N * 4
        + M * N * 4
    )

    out = pl.pallas_call(
        _proj_kernel,
        out_shape=jax.ShapeDtypeStruct((M, N), jnp.float32),
        grid_spec=pltpu.PrefetchScalarGridSpec(
            num_scalar_prefetch=0,
            grid=grid,
            in_specs=[
                pl.BlockSpec((tm, K), lambda i: (i, 0)),   # patches: stream over M
                pl.BlockSpec((K, N), lambda i: (0, 0)),    # weight: resident
                pl.BlockSpec((1, N), lambda i: (0, 0)),    # bias:   resident
            ],
            out_specs=pl.BlockSpec((tm, N), lambda i: (i, 0)),
        ),
        compiler_params=pltpu.CompilerParams(
            dimension_semantics=("parallel",),
        ),
        cost_estimate=pl.CostEstimate(
            flops=2 * M * K * N,
            bytes_accessed=bytes_accessed,
            transcendentals=0,
        ),
    )(patches, w_flat, bias2d)
    return out


def patch_embed_forward(
    x, weight, bias, *, patch_size=4, kernel_size=None, compute_dtype=jnp.bfloat16
):
    """Equivalent of PatchEmbed.forward.

    x: (B, C, H, W) float32, weight: (embed_dim, C, k, k), bias: (embed_dim,)
    returns (B, embed_dim, H_out, W_out) float32.
    """
    if kernel_size is None:
        kernel_size = patch_size
    k = kernel_size
    p = patch_size
    pad = (k - p + 1) // 2

    B, C, H, W = x.shape
    embed_dim = weight.shape[0]

    if k == p:
        # pad == 0: non-overlapping patches -> pure layout shuffle (no gather).
        nH = (H - k) // p + 1
        nW = (W - k) // p + 1
        xp = x[:, :, : nH * p, : nW * p].reshape(B, C, nH, p, nW, p)
        xp = jnp.transpose(xp, (0, 2, 4, 1, 3, 5))        # (B, nH, nW, C, p, p)
        patches = xp.reshape(B * nH * nW, C * k * k)      # (M, K)
    else:
        # General path: reflect pad + gather-style im2col (plain JAX glue).
        if pad > 0:
            x = jnp.pad(x, ((0, 0), (0, 0), (pad, pad), (pad, pad)), mode="reflect")
        Hp, Wp = x.shape[2], x.shape[3]
        nH = (Hp - k) // p + 1
        nW = (Wp - k) // p + 1
        row = (jnp.arange(nH) * p)[:, None] + jnp.arange(k)[None, :]  # (nH, k)
        col = (jnp.arange(nW) * p)[:, None] + jnp.arange(k)[None, :]  # (nW, k)
        xp = x[:, :, row, :]          # (B, C, nH, k, Wp)
        xp = xp[:, :, :, :, col]      # (B, C, nH, k, nW, k)
        xp = jnp.transpose(xp, (0, 2, 4, 1, 3, 5))        # (B, nH, nW, C, k, k)
        patches = xp.reshape(B * nH * nW, C * k * k)      # (M, K)

    w_flat = weight.reshape(embed_dim, C * k * k).T       # (K, N)

    # bf16 operands, f32 accumulation inside the kernel (MXU native rate,
    # half the HBM traffic on the patches stream).
    patches = patches.astype(compute_dtype)
    w_flat = w_flat.astype(compute_dtype)

    out2d = _pallas_proj(patches, w_flat, bias)           # (M, N) f32

    out = out2d.reshape(B, nH, nW, embed_dim)
    out = jnp.transpose(out, (0, 3, 1, 2))                # NCHW (module contract)
    return out


def _reference_conv(x, weight, bias, *, patch_size=4, kernel_size=None):
    """Pure-JAX f32 reference (reflect pad + strided valid conv)."""
    if kernel_size is None:
        kernel_size = patch_size
    k = kernel_size
    p = patch_size
    pad = (k - p + 1) // 2
    if pad > 0:
        x = jnp.pad(x, ((0, 0), (0, 0), (pad, pad), (pad, pad)), mode="reflect")
    y = jax.lax.conv_general_dilated(
        x, weight, window_strides=(p, p), padding="VALID",
        dimension_numbers=("NCHW", "OIHW", "NCHW"),
    )
    return y + bias[None, :, None, None]


if __name__ == "__main__":
    patch_size = 4
    in_chans = 3
    embed_dim = 96
    B, H, W = 2, 16, 16

    key = jax.random.PRNGKey(0)
    kx, kw, kb = jax.random.split(key, 3)
    x = jax.random.normal(kx, (B, in_chans, H, W), dtype=jnp.float32)
    # Deterministic synthetic parameters (shapes match nn.Conv2d of the module).
    weight = 0.05 * jax.random.normal(
        kw, (embed_dim, in_chans, patch_size, patch_size), dtype=jnp.float32
    )
    bias = 0.01 * jax.random.normal(kb, (embed_dim,), dtype=jnp.float32)

    fwd = jax.jit(
        functools.partial(patch_embed_forward, patch_size=patch_size, kernel_size=None)
    )
    out = fwd(x, weight, bias)
    out = jax.block_until_ready(out)

    ref = _reference_conv(x, weight, bias, patch_size=patch_size, kernel_size=None)
    assert out.shape == (B, embed_dim, H // patch_size, W // patch_size), out.shape
    # bf16 operands, f32 accumulation -> loosened tolerance vs. f32 reference.
    assert jnp.allclose(out, ref, atol=3e-2, rtol=3e-2), "mismatch vs reference conv"

    print("KERNEL_OK")
</pallas_src>

<mosaic_0001>
module attributes {stable_mosaic.version = 11 : i64} {
  func.func @_proj_kernel(%arg0: i32, %arg1: memref<32x48xbf16, #tpu.memory_space<vmem>>, %arg2: memref<48x96xbf16, #tpu.memory_space<vmem>>, %arg3: memref<1x96xf32, #tpu.memory_space<vmem>>, %arg4: memref<32x96xf32, #tpu.memory_space<vmem>>) attributes {dimension_semantics = [#tpu.dimension_semantics<parallel>], iteration_bounds = array<i64: 1>, scalar_prefetch = 0 : i64, scratch_operands = 0 : i64, tpu.core_type = #tpu.core_type<tc>, window_params = [{transform_indices = @transform_0, window_bounds = array<i64: 32, 48>}, {pipeline_mode = #tpu.pipeline_mode<synchronous>, transform_indices = @transform_1, window_bounds = array<i64: 48, 96>}, {pipeline_mode = #tpu.pipeline_mode<synchronous>, transform_indices = @transform_2, window_bounds = array<i64: 1, 96>}, {transform_indices = @transform_3, window_bounds = array<i64: 32, 96>}]} {
    %c0 = arith.constant 0 : index
    %c0_0 = arith.constant 0 : index
    %0 = vector.load %arg1[%c0, %c0_0] : memref<32x48xbf16, #tpu.memory_space<vmem>>, vector<32x48xbf16>
    %c0_1 = arith.constant 0 : index
    %c0_2 = arith.constant 0 : index
    %1 = vector.load %arg2[%c0_1, %c0_2] : memref<48x96xbf16, #tpu.memory_space<vmem>>, vector<48x96xbf16>
    %cst = arith.constant dense<0.000000e+00> : vector<32x96xf32>
    %2 = tpu.matmul %0, %1, %cst {dimension_numbers = #tpu.dot_dimension_numbers<[1], [0], [0], [1], [0, 0, 1, 1], [], []>} : vector<32x48xbf16>, vector<48x96xbf16>, vector<32x96xf32> -> vector<32x96xf32>
    %c0_3 = arith.constant 0 : index
    %c0_4 = arith.constant 0 : index
    %3 = vector.load %arg3[%c0_3, %c0_4] : memref<1x96xf32, #tpu.memory_space<vmem>>, vector<1x96xf32>
    %4 = vector.broadcast %3 : vector<1x96xf32> to vector<32x96xf32>
    %5 = arith.addf %2, %4 : vector<32x96xf32>
    %c0_5 = arith.constant 0 : index
    %c0_6 = arith.constant 0 : index
    %6 = vector.load %arg4[%c0_5, %c0_6] : memref<32x96xf32, #tpu.memory_space<vmem>>, vector<32x96xf32>
    tpu.vector_store %arg4[%c0_5, %c0_6], %5 {strides = array<i32>} : memref<32x96xf32, #tpu.memory_space<vmem>>, vector<32x96xf32>,
    return
  }
  func.func @transform_0(%arg0: i32) -> (i32, i32) {
    %c0_i32 = arith.constant 0 : i32
    %c0_i32_0 = arith.constant 0 : i32
    return %arg0, %c0_i32 : i32, i32
  }
  func.func @transform_1(%arg0: i32) -> (i32, i32) {
    %c0_i32 = arith.constant 0 : i32
    %c0_i32_0 = arith.constant 0 : i32
    %c0_i32_1 = arith.constant 0 : i32
    return %c0_i32, %c0_i32_0 : i32, i32
  }
  func.func @transform_2(%arg0: i32) -> (i32, i32) {
    %c0_i32 = arith.constant 0 : i32
    %c0_i32_0 = arith.constant 0 : i32
    %c0_i32_1 = arith.constant 0 : i32
    return %c0_i32, %c0_i32_0 : i32, i32
  }
  func.func @transform_3(%arg0: i32) -> (i32, i32) {
    %c0_i32 = arith.constant 0 : i32
    %c0_i32_0 = arith.constant 0 : i32
    return %arg0, %c0_i32 : i32, i32
  }
}

</mosaic_0001>

<bundles_post_ra>
// kernel: patch_embed_forward.1
= control target key start
LH: loop header
LB: loop body
LE: loop exit
PB: predicated region body
PF: predicated region fallthrough
CT: control target
= control target key end

     0   :  { %vm61_vm0 = vcmask 392192   ;;  %s246_s0 = inlined_call_operand.vmem [shape: bf16[32,48], index: 0, kind: input, shape index: {}]   ;;  %s247_s1 = inlined_call_operand.vmem [shape: bf16[48,96], index: 1, kind: input, shape index: {}]   ;;  %s248_s2 = inlined_call_operand.vmem [shape: f32[1,96], index: 2, kind: input, shape index: {}]   ;;  %s249_s3 = inlined_call_operand.hbm [shape: f32[32,96], index: 3, kind: output, shape index: {}]  }
   0x1   :  { %v164_v0 = vld [vmem:[%s247_s1] sm:$0xff]   ;;  %v165_v1 = vld [vmem:[%s247_s1 + $0x8] sm:$0xff]   ;;  %v166_v3 = vld [vmem:[%s247_s1 + $0x10] sm:$0xff]  }
   0x2   :  { %151 = vmatprep.subr.bf16.mxu0 %v164_v0  ;;  %v167_v2 = vld [vmem:[%s246_s0] sm:$0xff]  }
   0x3   :  { %152 = vmatpush3.bf16.msra.mxu0 %v164_v0  ;;  %157 = vmatprep.mubr.msk.bf16.mxu0 %vm61_vm0, %v167_v2 }
   0x4   :  { %153 = vmatprep.subr.bf16.mxu0 %v165_v1 }
   0x5   :  { %8 = vsyncpa [#allocation3], 0  ;;  %v168_v4 = vld [vmem:[%s246_s0 + $0x8] sm:$0xff]   ;;  %v138_v5 = vld [vmem:[%s248_s2] ss:$0 sm:$0xff]  ;;  %vm117_vm1 = vcmask 785408  }
   0x6   :  { %s193_s24 = smov [#allocation2]  }
   0x7   :  { %154 = vmatpush3.bf16.msra.mxu0 %v165_v1  ;;  %s127_s25 = sshll.u32 %s193_s24, 4  ;;  %s128_s25 = int_to_ptr.vmem [resolvable:$true] %s127_s25 }
   0x8   :  { %155 = vmatprep.subr.bf16.mxu0 %v166_v3  ;;  %s169_s0 = scalar_lea.vmem %s128_s25, 512  ;;  %p174_p1 = scmp.lt.s32.totalorder %s128_s25, %s128_s25 }
   0x9   :  { %p170_p0 = scmp.ne.s32.totalorder %s128_s25, %s169_s0  ;;  %p175_p2 = scmp.lt.s32.totalorder %s169_s0, %s169_s0 }
   0xb   :  { %156 = vmatpush3.bf16.msra.mxu0 %v166_v3  ;;  %p176_p3 = por %p175_p2, %p174_p1 }
   0xd   :  { %p177_p4 = pnand %p176_p3, %p170_p0 }
   0xe   :  { %158 = vmatmul.mubr.msk.bf16.vlgmr.msra.gmra.mrb[0].mxu0 %vm61_vm0, %v168_v4 }
  0xe1   :  { %v159_v6 = vpop.f32.mrb[0].mxu0 }
  0xe2   :  { %v111_v7 = vadd.f32 %v159_v6, %v138_v5  ;;  %v102_v8 = vpop.f32.mrb[1].mxu0 }
  0xe3   :  { %v103_v9 = vadd.f32 %v138_v5, %v102_v8  ;;  %v160_v10 = vpop.f32.mrb[2].mxu0 }
  0xe4   :  { %120 = vst.msk [vmem:[#allocation2 + $0x10] sm:$0xff] %vm117_vm1, %v111_v7  ;;  %v114_v11 = vadd.f32 %v160_v10, %v138_v5  ;;  %v105_v12 = vpop.f32.mrb[3].mxu0 }
  0xe5   :  { %118 = vst.msk [vmem:[#allocation2] sm:$0xff] %vm117_vm1, %v103_v9  ;;  %v106_v13 = vadd.f32 %v138_v5, %v105_v12 }
  0xe6   :  { %121 = vst.msk [vmem:[#allocation2 + $0x18] sm:$0xff] %vm117_vm1, %v114_v11 }
  0xe7   :  { %119 = vst.msk [vmem:[#allocation2 + $0x8] sm:$0xff] %vm117_vm1, %v106_v13 }
  0xe8   :  { %180 = shalt.err (!%p177_p4)
}
  0xe9   :  { %s181_s26 = scalar_lea.hbm %s249_s3, 512 }
  0xea   :  { %p182_p5 = scmp.ne.s32.totalorder %s249_s3, %s181_s26  ;;  %p185_p6 = scmp.lt.u32.totalorder %s181_s26, %s249_s3 }
  0xec   :  { %p187_p7 = pnand %p185_p6, %p182_p5 }
  0xee   :  { %190 = shalt.err (!%p187_p7)
}
  0xef   :  { %s194_s4 = smov 128   ;;  %s195_s5 = smov 8  }
  0xf0   :  { %133 = dma.vmem_to_hbm [thread:$0]  %s128_s25, 512, %s249_s3, [#allocation3], %s194_s4, %s194_s4, %s195_s5  }
  0xf1   :  { %191 = dma.done.wait [#allocation3], 512  }
  0xf2   :  { %192 = vsyncadd [#allocation3], 4294966784 }
  0xf3   :  { %137 = vsyncpa [#allocation3], 1 }

</bundles_post_ra>
